<compile_context>
chip_gen: v7x
topology: tpu7x:2x2x1
jax: 0.10.0
libtpu: 0.0.40
codegen_flags: <defaults>
</compile_context>

<pallas_src>
import jax
import jax.numpy as jnp
from jax import lax
from jax.experimental import pallas as pl
from jax.experimental.pallas import tpu as pltpu

LANES = 128
SUBLANES = 8
VREG_ELEMS = SUBLANES * LANES            # 1024
MAX_REDUCE_ROWS = 4096                   # 2 MiB per f32 input stream
MAX_ELEM_ROWS = 2048                     # 1 MiB per f32 stream (in + out streams)
VMEM_LIMIT_BYTES = 32 * 1024 * 1024      # safe on v5e/v6e (128 MiB) and v7x (64 MiB)

_NCORES_CACHE = None


def _num_tensorcores():
    """Best-effort TensorCores-per-chip. Only v7x exposes 2 TCs we shard over;
    any detection failure falls back to 1 (always correct, just unsplit)."""
    global _NCORES_CACHE
    if _NCORES_CACHE is None:
        n = 1
        try:
            kind = jax.devices()[0].device_kind.lower()
            if "v7" in kind:
                n = 2
        except Exception:
            n = 1
        _NCORES_CACHE = n
    return _NCORES_CACHE


# ---------------------------------------------------------------------------
# Kernels
# ---------------------------------------------------------------------------
def _make_elementwise_kernel(has_weight, loss_weight):
    """Per-tile: loss_weight * (pred - target)^2 [* weight]."""

    def kernel(*refs):
        if has_weight:
            p_ref, t_ref, w_ref, o_ref = refs
        else:
            p_ref, t_ref, o_ref = refs
        d = p_ref[...].astype(jnp.float32) - t_ref[...].astype(jnp.float32)
        val = d * d
        if has_weight:
            val = val * w_ref[...].astype(jnp.float32)
        o_ref[...] = (loss_weight * val).astype(o_ref.dtype)

    return kernel


def _make_reduce_kernel(has_weight, block_rows, steps_per_core, valid_rows, guard):
    """Accumulate per-core partial sums of (pred - target)^2 [* weight] into an
    (8,128) f32 output block resident across the inner (arbitrary) grid axis.

    Steady state is pure VPU work (sub, square, [mul], fold-add).  When `guard`
    is False the grid covers the slab exactly and no branch is emitted at all;
    otherwise whole-block scalar `pl.when` guards skip fully out-of-range
    (duplicated, clamped) blocks and row-mask the single partial tail block.
    NOTE: plain f32 accumulation; for >~1e8 elements consider a pairwise split.
    """
    nfold = block_rows // SUBLANES

    def kernel(*refs):
        if has_weight:
            p_ref, t_ref, w_ref, o_ref = refs
        else:
            p_ref, t_ref, o_ref = refs
        j = pl.program_id(1)

        @pl.when(j == 0)
        def _():
            o_ref[...] = jnp.zeros_like(o_ref)

        def block_val():
            d = p_ref[...].astype(jnp.float32) - t_ref[...].astype(jnp.float32)
            v = d * d
            if has_weight:
                v = v * w_ref[...].astype(jnp.float32)
            return v

        def fold(v):
            # (block_rows,128) -> (8,128): sublane-tile-preserving reshape +
            # adds over the major axis (pure VPU, no per-step XLU reduce).
            return v.reshape(nfold, SUBLANES, LANES).sum(axis=0)

        if not guard:
            o_ref[...] += fold(block_val())
        else:
            c = pl.program_id(0)
            start = (c * steps_per_core + j) * block_rows

            # Full in-range block: clean path (runs every steady-state step).
            @pl.when(start + block_rows <= valid_rows)
            def _():
                o_ref[...] += fold(block_val())

            # Partial tail block: fires at most once per core.
            @pl.when(jnp.logical_and(start < valid_rows,
                                     start + block_rows > valid_rows))
            def _():
                row = start + lax.broadcasted_iota(
                    jnp.int32, (block_rows, LANES), 0)
                o_ref[...] += fold(jnp.where(row < valid_rows, block_val(), 0.0))
            # Blocks entirely past valid_rows (clamped duplicates) add nothing.

    return kernel


# ---------------------------------------------------------------------------
# Wrappers
# ---------------------------------------------------------------------------
def _as_rows(x):
    """Flatten to a lane-dense (rows, 128) slab in the *native* dtype.
    Pads with zeros only when numel is not a multiple of 8*128.
    TODO(synk): the pad is a full HBM copy when numel is ragged; a tail-only
    handling would need a non-(rows,128) layout and is not worth it here."""
    flat = x.reshape(-1)
    numel = flat.shape[0]
    padded = pl.cdiv(numel, VREG_ELEMS) * VREG_ELEMS
    if padded != numel:
        flat = jnp.pad(flat, (0, padded - numel))
    return flat.reshape(-1, LANES)


def _prep(pred, target, weight):
    orig_shape = pred.shape
    numel = int(pred.size)

    inputs = [pred, target]
    if weight is not None:
        if tuple(weight.shape) != tuple(orig_shape):
            # TODO(synk): broadcast low-rank weights inside the kernel (reused /
            # stride-0 BlockSpec) instead of materializing a full HBM copy.
            weight = jnp.broadcast_to(weight, orig_shape)
        inputs.append(weight)

    arrays = [_as_rows(x) for x in inputs]
    rows = arrays[0].shape[0]                 # always a multiple of 8
    return arrays, rows, numel, orig_shape


def _mse_none(pred, target, weight, loss_weight, ncores):
    arrays, rows, numel, orig_shape = _prep(pred, target, weight)
    block_rows = min(MAX_ELEM_ROWS, rows)
    nb = pl.cdiv(rows, block_rows)

    if ncores >= 2 and nb >= 2:
        spc = pl.cdiv(nb, ncores)
        if ncores * spc == nb:
            imap = lambda c, j: (c * spc + j, 0)
        else:
            # Clamp so no DMA targets a fully out-of-range block; the (at most
            # one) duplicated block is simply rewritten with identical data.
            imap = lambda c, j: (jnp.minimum(c * spc + j, nb - 1), 0)
        tile = pl.BlockSpec((block_rows, LANES), imap)
        grid = (ncores, spc)
        sem = (pltpu.CORE_PARALLEL, pltpu.ARBITRARY)
    else:
        tile = pl.BlockSpec((block_rows, LANES), lambda i: (i, 0))
        grid = (nb,)
        sem = (pltpu.PARALLEL,)

    out = pl.pallas_call(
        _make_elementwise_kernel(weight is not None, float(loss_weight)),
        out_shape=jax.ShapeDtypeStruct((rows, LANES), pred.dtype),
        grid_spec=pltpu.PrefetchScalarGridSpec(
            num_scalar_prefetch=0,
            grid=grid,
            in_specs=[tile] * len(arrays),
            out_specs=tile,
        ),
        compiler_params=pltpu.CompilerParams(
            dimension_semantics=sem,
            vmem_limit_bytes=VMEM_LIMIT_BYTES,
        ),
    )(*arrays)

    flat = out.reshape(-1)
    if flat.shape[0] != numel:
        flat = flat[:numel]          # only a copy when padding actually occurred
    return flat.reshape(orig_shape)


def _mse_reduced(pred, target, weight, loss_weight, denom, ncores):
    arrays, rows, numel, _ = _prep(pred, target, weight)
    block_rows = min(MAX_REDUCE_ROWS, rows)
    nb = pl.cdiv(rows, block_rows)
    ncores = ncores if nb >= 2 else 1
    spc = pl.cdiv(nb, ncores)
    # Exact cover -> no guards compiled at all (pure 3-op steady-state loop).
    full_cover = (ncores * spc == nb) and (rows % block_rows == 0)

    if full_cover:
        in_map = lambda c, j: (c * spc + j, 0)
    else:
        # Clamp so no DMA targets a fully out-of-range block; in-kernel scalar
        # guards skip / mask any duplicated or ragged contribution.
        in_map = lambda c, j: (jnp.minimum(c * spc + j, nb - 1), 0)
    tile = pl.BlockSpec((block_rows, LANES), in_map)

    if ncores >= 2:
        sem = (pltpu.CORE_PARALLEL, pltpu.ARBITRARY)   # v7x: shard across both TCs
    else:
        sem = (pltpu.ARBITRARY, pltpu.ARBITRARY)

    partials = pl.pallas_call(
        _make_reduce_kernel(weight is not None, block_rows, spc, rows,
                            not full_cover),
        out_shape=jax.ShapeDtypeStruct((ncores * SUBLANES, LANES), jnp.float32),
        grid_spec=pltpu.PrefetchScalarGridSpec(
            num_scalar_prefetch=0,
            grid=(ncores, spc),
            in_specs=[tile] * len(arrays),
            out_specs=pl.BlockSpec((SUBLANES, LANES), lambda c, j: (c, 0)),
        ),
        compiler_params=pltpu.CompilerParams(
            dimension_semantics=sem,
            vmem_limit_bytes=VMEM_LIMIT_BYTES,
        ),
    )(*arrays)

    total = jnp.sum(partials)                 # single tiny cross-lane reduce
    return (total * (loss_weight / denom)).astype(pred.dtype)


def mse_loss_pallas(pred, target, weight=None, reduction="mean", avg_factor=None,
                    loss_weight=1.0):
    ncores = _num_tensorcores()
    numel = int(pred.size)
    if avg_factor is not None:
        if reduction == "mean":
            return _mse_reduced(pred, target, weight, loss_weight, avg_factor, ncores)
        elif reduction == "none":
            return _mse_none(pred, target, weight, loss_weight, ncores)
        else:
            raise ValueError('avg_factor can not be used with reduction="sum"')
    if reduction == "none":
        return _mse_none(pred, target, weight, loss_weight, ncores)
    elif reduction == "sum":
        return _mse_reduced(pred, target, weight, loss_weight, 1.0, ncores)
    elif reduction == "mean":
        return _mse_reduced(pred, target, weight, loss_weight, numel, ncores)
    else:
        raise ValueError(f"unknown reduction {reduction}")


class MSELoss:
    """Pallas-TPU re-implementation of mogen MSELoss (no learnable params)."""

    def __init__(self, reduction="mean", loss_weight=1.0):
        assert reduction in (None, "none", "mean", "sum")
        self.reduction = "none" if reduction is None else reduction
        self.loss_weight = loss_weight

    def __call__(self, pred, target, weight=None, avg_factor=None,
                 reduction_override=None):
        assert reduction_override in (None, "none", "mean", "sum")
        reduction = reduction_override if reduction_override else self.reduction
        return mse_loss_pallas(pred, target, weight=weight, reduction=reduction,
                               avg_factor=avg_factor, loss_weight=self.loss_weight)


# ---------------------------------------------------------------------------
# Demo / self-check
# ---------------------------------------------------------------------------
if __name__ == "__main__":
    key = jax.random.PRNGKey(0)
    k1, k2, k3, k4, k5 = jax.random.split(key, 5)

    shape = (2, 4, 16, 16)  # small NCHW-like motion-feature tensor (numel = 2048)
    pred = jax.random.normal(k1, shape, dtype=jnp.float32)
    target = jax.random.normal(k2, shape, dtype=jnp.float32)
    weight = jax.random.uniform(k3, shape, dtype=jnp.float32)

    loss_mod = MSELoss(reduction="mean", loss_weight=2.0)

    # mean reduction, no weight (exercises the no-weight kernel)
    out_mean = jax.block_until_ready(loss_mod(pred, target))
    ref_mean = 2.0 * jnp.mean((pred - target) ** 2)
    assert jnp.allclose(out_mean, ref_mean, rtol=1e-5, atol=1e-6)

    # sum reduction with per-element weight
    out_sum = jax.block_until_ready(
        loss_mod(pred, target, weight=weight, reduction_override="sum"))
    ref_sum = 2.0 * jnp.sum(((pred - target) ** 2) * weight)
    assert jnp.allclose(out_sum, ref_sum, rtol=1e-5, atol=1e-5)

    # no reduction
    out_none = jax.block_until_ready(
        loss_mod(pred, target, weight=weight, reduction_override="none"))
    ref_none = 2.0 * ((pred - target) ** 2) * weight
    assert out_none.shape == shape
    assert jnp.allclose(out_none, ref_none, rtol=1e-5, atol=1e-6)

    # mean with avg_factor override
    out_avg = jax.block_until_ready(
        loss_mod(pred, target, weight=weight, avg_factor=100.0))
    ref_avg = 2.0 * jnp.sum(((pred - target) ** 2) * weight) / 100.0
    assert jnp.allclose(out_avg, ref_avg, rtol=1e-5, atol=1e-6)

    # ragged shape (numel not a multiple of 1024) -> exercises pad + tail guard
    rshape = (2, 3, 50, 17)  # 5100 elements
    rp = jax.random.normal(k4, rshape, dtype=jnp.float32)
    rt = jax.random.normal(k5, rshape, dtype=jnp.float32)
    out_r = jax.block_until_ready(loss_mod(rp, rt))
    ref_r = 2.0 * jnp.mean((rp - rt) ** 2)
    assert jnp.allclose(out_r, ref_r, rtol=1e-5, atol=1e-6)
    out_rn = jax.block_until_ready(loss_mod(rp, rt, reduction_override="none"))
    assert out_rn.shape == rshape
    assert jnp.allclose(out_rn, 2.0 * (rp - rt) ** 2, rtol=1e-5, atol=1e-6)

    print("KERNEL_OK")
</pallas_src>

<mosaic_0001>
module attributes {stable_mosaic.version = 11 : i64} {
  func.func @kernel(%arg0: i32, %arg1: i32, %arg2: memref<16x128xf32, #tpu.memory_space<vmem>>, %arg3: memref<16x128xf32, #tpu.memory_space<vmem>>, %arg4: memref<8x128xf32, #tpu.memory_space<vmem>>) attributes {dimension_semantics = [#tpu.dimension_semantics<arbitrary>, #tpu.dimension_semantics<arbitrary>], iteration_bounds = array<i64: 1, 1>, scalar_prefetch = 0 : i64, scratch_operands = 0 : i64, tpu.core_type = #tpu.core_type<tc>, window_params = [{transform_indices = @transform_0, window_bounds = array<i64: 16, 128>}, {transform_indices = @transform_1, window_bounds = array<i64: 16, 128>}, {transform_indices = @transform_2, window_bounds = array<i64: 8, 128>}]} {
    %c0_i32 = arith.constant 0 : i32
    %0 = arith.cmpi eq, %arg1, %c0_i32 : i32
    %1 = arith.extui %0 : i1 to i32
    %c0_i32_0 = arith.constant 0 : i32
    %2 = arith.cmpi ne, %1, %c0_i32_0 : i32
    scf.if %2 {
      %cst_8 = arith.constant 0.000000e+00 : f32
      %12 = vector.broadcast %cst_8 : f32 to vector<8x128xf32>
      %c0_9 = arith.constant 0 : index
      %c0_10 = arith.constant 0 : index
      %13 = vector.load %arg4[%c0_9, %c0_10] : memref<8x128xf32, #tpu.memory_space<vmem>>, vector<8x128xf32>
      tpu.vector_store %arg4[%c0_9, %c0_10], %12 {strides = array<i32>} : memref<8x128xf32, #tpu.memory_space<vmem>>, vector<8x128xf32>,
    } else {
    }
    %c0 = arith.constant 0 : index
    %c0_1 = arith.constant 0 : index
    %3 = vector.load %arg4[%c0, %c0_1] : memref<8x128xf32, #tpu.memory_space<vmem>>, vector<8x128xf32>
    %c0_2 = arith.constant 0 : index
    %c0_3 = arith.constant 0 : index
    %4 = vector.load %arg2[%c0_2, %c0_3] : memref<16x128xf32, #tpu.memory_space<vmem>>, vector<16x128xf32>
    %c0_4 = arith.constant 0 : index
    %c0_5 = arith.constant 0 : index
    %5 = vector.load %arg3[%c0_4, %c0_5] : memref<16x128xf32, #tpu.memory_space<vmem>>, vector<16x128xf32>
    %6 = arith.subf %4, %5 : vector<16x128xf32>
    %7 = arith.mulf %6, %6 : vector<16x128xf32>
    %8 = vector.shape_cast %7 : vector<16x128xf32> to vector<2x8x128xf32>
    %cst = arith.constant dense<0.000000e+00> : vector<8x128xf32>
    %9 = vector.multi_reduction <add>, %8, %cst [0] : vector<2x8x128xf32> to vector<8x128xf32>
    %10 = arith.addf %3, %9 : vector<8x128xf32>
    %c0_6 = arith.constant 0 : index
    %c0_7 = arith.constant 0 : index
    %11 = vector.load %arg4[%c0_6, %c0_7] : memref<8x128xf32, #tpu.memory_space<vmem>>, vector<8x128xf32>
    tpu.vector_store %arg4[%c0_6, %c0_7], %10 {strides = array<i32>} : memref<8x128xf32, #tpu.memory_space<vmem>>, vector<8x128xf32>,
    return
  }
  func.func @transform_0(%arg0: i32, %arg1: i32) -> (i32, i32) {
    %c1_i32 = arith.constant 1 : i32
    %0 = arith.muli %arg0, %c1_i32 : i32
    %1 = arith.addi %0, %arg1 : i32
    %c0_i32 = arith.constant 0 : i32
    %c0_i32_0 = arith.constant 0 : i32
    return %1, %c0_i32 : i32, i32
  }
  func.func @transform_1(%arg0: i32, %arg1: i32) -> (i32, i32) {
    %c1_i32 = arith.constant 1 : i32
    %0 = arith.muli %arg0, %c1_i32 : i32
    %1 = arith.addi %0, %arg1 : i32
    %c0_i32 = arith.constant 0 : i32
    %c0_i32_0 = arith.constant 0 : i32
    return %1, %c0_i32 : i32, i32
  }
  func.func @transform_2(%arg0: i32, %arg1: i32) -> (i32, i32) {
    %c0_i32 = arith.constant 0 : i32
    %c0_i32_0 = arith.constant 0 : i32
    return %arg0, %c0_i32 : i32, i32
  }
}

</mosaic_0001>

<bundles_post_ra>
// kernel: tpu_custom_call.1
= control target key start
LH: loop header
LB: loop body
LE: loop exit
PB: predicated region body
PF: predicated region fallthrough
CT: control target
= control target key end

     0   :  { %7 = vsyncpa [#allocation3], 0  ;;  %s219_s0 = inlined_call_operand.hbm [shape: f32[16,128], index: 0, kind: input, shape index: {}]   ;;  %s220_s1 = inlined_call_operand.hbm [shape: f32[16,128], index: 1, kind: input, shape index: {}]   ;;  %s221_s2 = inlined_call_operand.hbm [shape: f32[8,128], index: 2, kind: output, shape index: {}]  }
   0x1   :  { %8 = vsyncpa [#allocation6], 0 }
   0x2   :  { %9 = vsyncpa [#allocation4], 0  ;;  %s163_s9 = smov [#allocation2]   ;;  %s91_s13 = scalar_lea.hbm %s219_s0, 256 }
   0x3   :  { %s19_s10 = sshll.u32 %s163_s9, 4  ;;  %p92_p0 = scmp.ne.s32.totalorder %s219_s0, %s91_s13  ;;  %s20_s10 = int_to_ptr.vmem [resolvable:$true] %s19_s10 }
   0x4   :  { %p95_p1 = scmp.lt.u32.totalorder %s91_s13, %s219_s0 }
   0x6   :  { %p97_p2 = pnand %p95_p1, %p92_p0 }
   0x8   :  { %100 = shalt.err (!%p97_p2)
}
   0x9   :  { %s101_s18 = scalar_lea.vmem %s20_s10, 256  ;;  %p106_p4 = scmp.lt.s32.totalorder %s20_s10, %s20_s10 }
   0xa   :  { %p102_p3 = scmp.ne.s32.totalorder %s20_s10, %s101_s18  ;;  %p107_p5 = scmp.lt.s32.totalorder %s101_s18, %s101_s18 }
   0xc   :  { %p108_p6 = por %p107_p5, %p106_p4 }
   0xe   :  { %p109_p7 = pnand %p108_p6, %p102_p3 }
  0x10   :  { %112 = shalt.err (!%p109_p7)
}
  0x11   :  { %s164_s19 = smov 128   ;;  %s165_s20 = smov 8  }
  0x12   :  { %25 = dma.hbm_to_vmem [thread:$0]  %s219_s0, 256, %s20_s10, [#allocation3], %s164_s19, %s164_s19, %s165_s20  }
  0x13   :  { %s166_s23 = smov [#allocation5]   ;;  %s113_s27 = scalar_lea.hbm %s220_s1, 256 }
  0x14   :  { %s35_s24 = sshll.u32 %s166_s23, 4  ;;  %p114_p8 = scmp.ne.s32.totalorder %s220_s1, %s113_s27  ;;  %s36_s24 = int_to_ptr.vmem [resolvable:$true] %s35_s24 }
  0x15   :  { %p117_p9 = scmp.lt.u32.totalorder %s113_s27, %s220_s1 }
  0x17   :  { %p119_p10 = pnand %p117_p9, %p114_p8 }
  0x19   :  { %122 = shalt.err (!%p119_p10)
}
  0x1a   :  { %s123_s4 = scalar_lea.vmem %s36_s24, 256  ;;  %p128_p12 = scmp.lt.s32.totalorder %s36_s24, %s36_s24 }
  0x1b   :  { %p124_p11 = scmp.ne.s32.totalorder %s36_s24, %s123_s4  ;;  %p129_p13 = scmp.lt.s32.totalorder %s123_s4, %s123_s4 }
  0x1d   :  { %p130_p0 = por %p129_p13, %p128_p12 }
  0x1f   :  { %p131_p1 = pnand %p130_p0, %p124_p11 }
  0x21   :  { %134 = shalt.err (!%p131_p1)
}
  0x22   :  { %41 = dma.hbm_to_vmem [thread:$0]  %s220_s1, 256, %s36_s24, [#allocation6], %s164_s19, %s164_s19, %s165_s20  }
  0x23   :  { %157 = dma.done.wait [#allocation3], 256  }
  0x24   :  { %158 = vsyncadd [#allocation3], 4294967040 }
  0x25   :  { %159 = dma.done.wait [#allocation6], 256  }
  0x26   :  { %160 = vsyncadd [#allocation6], 4294967040  ;;  %v58_v0 = vld [vmem:[#allocation2] sm:$0xff]  ;;  %v59_v1 = vld [vmem:[#allocation2 + $0x8] sm:$0xff]  ;;  %s167_s6 = smov [#allocation7]  }
  0x27   :  { %v60_v2 = vld [vmem:[#allocation5] sm:$0xff]  ;;  %v61_v3 = vld [vmem:[#allocation5 + $0x8] sm:$0xff]  ;;  %s75_s7 = sshll.u32 %s167_s6, 4  ;;  %s76_s7 = int_to_ptr.vmem [resolvable:$true] %s75_s7 }
  0x28   :  { %v62_v4 = vsub.f32 %v58_v0, %v60_v2  ;;  %v63_v5 = vsub.f32 %v59_v1, %v61_v3  ;;  %s135_s8 = scalar_lea.vmem %s76_s7, 128  ;;  %p140_p3 = scmp.lt.s32.totalorder %s76_s7, %s76_s7 }
  0x29   :  { %p136_p2 = scmp.ne.s32.totalorder %s76_s7, %s135_s8  ;;  %p141_p4 = scmp.lt.s32.totalorder %s135_s8, %s135_s8 }
  0x2a   :  { %v64_v6 = vmul.f32 %v62_v4, %v62_v4  ;;  %v65_v7 = vmul.f32 %v63_v5, %v63_v5 }
  0x2b   :  { %p142_p5 = por %p141_p4, %p140_p3 }
  0x2c   :  { %v66_v8 = vadd.f32 %v65_v7, %v64_v6 }
  0x2d   :  { %p143_p6 = pnand %p142_p5, %p136_p2 }
  0x2e   :  { %68 = vst [vmem:[#allocation7] sm:$0xff] %v66_v8 }
  0x2f   :  { %146 = shalt.err (!%p143_p6)
}
  0x30   :  { %s147_s10 = scalar_lea.hbm %s221_s2, 128 }
  0x31   :  { %p148_p7 = scmp.ne.s32.totalorder %s221_s2, %s147_s10  ;;  %p151_p8 = scmp.lt.u32.totalorder %s147_s10, %s221_s2 }
  0x33   :  { %p153_p9 = pnand %p151_p8, %p148_p7 }
  0x35   :  { %156 = shalt.err (!%p153_p9)
}
  0x36   :  { %78 = dma.vmem_to_hbm [thread:$0]  %s76_s7, 128, %s221_s2, [#allocation4]  }
  0x37   :  { %161 = dma.done.wait [#allocation4], 128  }
  0x38   :  { %162 = vsyncadd [#allocation4], 4294967168 }
  0x39   :  { %82 = vsyncpa [#allocation3], 1 }
  0x3a   :  { %83 = vsyncpa [#allocation6], 1 }
  0x3b   :  { %84 = vsyncpa [#allocation4], 1 }

</bundles_post_ra>
